<compile_context>
chip_gen: v5e
topology: v5e:2x2
jax: 0.10.0
libtpu: 0.0.40
codegen_flags: <defaults>
</compile_context>

<pallas_src>
import functools

import jax
import jax.numpy as jnp
from jax.experimental import pallas as pl
from jax.experimental.pallas import tpu as pltpu


def _round_up(x, m):
    return ((x + m - 1) // m) * m


def _decoder_kernel(x_ref,
                    w1_ref, b1_ref,
                    w2_ref, b2_ref,
                    w3_ref, b3_ref,
                    w4_ref, b4_ref,
                    out_ref):
    """Fused 4-layer MLP: (Linear+ReLU) x3, Linear+Sigmoid.

    One grid step processes a tile of the batch; all (lane-padded, bf16)
    weights live fully in VMEM and are reused across grid steps.
    """
    # Hoist bias loads once (JAX does not CSE broadcasts).
    b1 = b1_ref[...]
    b2 = b2_ref[...]
    b3 = b3_ref[...]
    b4 = b4_ref[...]

    # bf16 operands for the MXU, f32 accumulation, f32 element-wise math.
    h = jnp.dot(x_ref[...], w1_ref[...], preferred_element_type=jnp.float32) + b1
    h = jnp.maximum(h, 0.0)

    h = jnp.dot(h.astype(jnp.bfloat16), w2_ref[...],
                preferred_element_type=jnp.float32) + b2
    h = jnp.maximum(h, 0.0)

    h = jnp.dot(h.astype(jnp.bfloat16), w3_ref[...],
                preferred_element_type=jnp.float32) + b3
    h = jnp.maximum(h, 0.0)

    logits = jnp.dot(h.astype(jnp.bfloat16), w4_ref[...],
                     preferred_element_type=jnp.float32) + b4
    # sigmoid(x) = 1 / (1 + exp(-x)); approx reciprocal runs on the EUP slot.
    out_ref[...] = pl.reciprocal(1.0 + jnp.exp(-logits), approx=True)


@functools.partial(jax.jit, static_argnames=("block_b",))
def decoder_forward(latent, params, *, block_b=1024):
    """latent: [B, latent_dim] f32 -> reconstructed: [B, input_size] f32."""
    (w1, b1), (w2, b2), (w3, b3), (w4, b4) = params
    B, L = latent.shape
    H2 = w1.shape[1]
    H1 = w2.shape[1]
    IN = w4.shape[1]

    # --- lane-pad hidden/output dims to multiples of 128; keep K=L for layer 1
    H2p, H1p, INp = (_round_up(d, 128) for d in (H2, H1, IN))

    def pad_wb(w, b, dip, dop):
        wp = jnp.zeros((dip, dop), jnp.float32).at[:w.shape[0], :w.shape[1]].set(w)
        bp = jnp.zeros((1, dop), jnp.float32).at[:, :b.shape[-1]].set(b.reshape(1, -1))
        return wp.astype(jnp.bfloat16), bp            # bias stays f32

    w1p, b1p = pad_wb(w1, b1, L, H2p)                 # latent dim NOT padded
    w2p, b2p = pad_wb(w2, b2, H2p, H1p)
    w3p, b3p = pad_wb(w3, b3, H1p, H1p)
    w4p, b4p = pad_wb(w4, b4, H1p, INp)

    # --- batch tiling: single grid step when the batch fits in one tile;
    # Pallas masks the partial last block, so no explicit batch padding.
    bb = max(8, min(block_b, _round_up(B, 8)))
    grid = (pl.cdiv(B, bb),)

    # bf16 input halves the dominant activation DMA; fuses into the cast copy.
    x = latent.astype(jnp.bfloat16)

    def full(shape):
        # Constant block index -> block stays resident across grid steps.
        return pl.BlockSpec(shape, lambda i: (0, 0))

    flops = 2 * B * (L * H2p + H2p * H1p + H1p * H1p + H1p * INp)
    bytes_accessed = (
        B * L * 2 + B * INp * 4
        + (w1p.size + w2p.size + w3p.size + w4p.size) * 2
        + (b1p.size + b2p.size + b3p.size + b4p.size) * 4)

    out = pl.pallas_call(
        _decoder_kernel,
        out_shape=jax.ShapeDtypeStruct((B, INp), jnp.float32),
        grid_spec=pltpu.PrefetchScalarGridSpec(
            num_scalar_prefetch=0,
            grid=grid,
            in_specs=[
                pl.BlockSpec((bb, L), lambda i: (i, 0)),    # latent tile (bf16)
                full((L, H2p)), full((1, H2p)),             # layer 1
                full((H2p, H1p)), full((1, H1p)),           # layer 2
                full((H1p, H1p)), full((1, H1p)),           # layer 3
                full((H1p, INp)), full((1, INp)),           # layer 4
            ],
            out_specs=pl.BlockSpec((bb, INp), lambda i: (i, 0)),
        ),
        compiler_params=pltpu.CompilerParams(
            dimension_semantics=("parallel",)),
        cost_estimate=pl.CostEstimate(
            flops=flops,
            transcendentals=B * INp,
            bytes_accessed=bytes_accessed),
    )(x, w1p, b1p, w2p, b2p, w3p, b3p, w4p, b4p)

    if INp != IN:                      # no-op when input_size is already 128-aligned
        out = out[:, :IN]
    return out


def init_decoder_params(key, latent_dim, h2_size, h1_size, input_size):
    """Deterministic param init (PyTorch-Linear-like), stored [in,out]/[1,out]."""
    dims = [(latent_dim, h2_size), (h2_size, h1_size),
            (h1_size, h1_size), (h1_size, input_size)]
    params = []
    for (din, dout) in dims:
        key, kw, kb = jax.random.split(key, 3)
        scale = 1.0 / jnp.sqrt(jnp.float32(din))
        w = jax.random.uniform(kw, (din, dout), jnp.float32, -scale, scale)
        b = jax.random.uniform(kb, (1, dout), jnp.float32, -scale, scale)
        params.append((w, b))
    return tuple(params)


def decoder_reference(latent, params):
    """Pure-JAX f32 reference mirroring the PyTorch forward."""
    (w1, b1), (w2, b2), (w3, b3), (w4, b4) = params
    h = jax.nn.relu(latent @ w1 + b1)
    h = jax.nn.relu(h @ w2 + b2)
    h = jax.nn.relu(h @ w3 + b3)
    return jax.nn.sigmoid(h @ w4 + b4)


if __name__ == "__main__":
    # Small, module-consistent sizes: args.latent=32, h2_size=64, h1_size=64,
    # input_size=128, batch=16.
    LATENT, H2, H1, INPUT = 32, 64, 64, 128
    BATCH = 16

    key = jax.random.PRNGKey(0)
    kx, kp = jax.random.split(key)
    latent = jax.random.normal(kx, (BATCH, LATENT), jnp.float32)
    params = init_decoder_params(kp, LATENT, H2, H1, INPUT)

    out = decoder_forward(latent, params)
    out = jax.block_until_ready(out)
    ref = decoder_reference(latent, params)
    assert out.shape == (BATCH, INPUT)
    # bf16 matmul operands with f32 accumulation -> loose-but-tight-enough tol.
    assert jnp.max(jnp.abs(out - ref)) < 2e-2, "mismatch vs f32 reference"

    # Exercise the partial-last-block path (batch not a multiple of sublane 8).
    latent2 = jax.random.normal(kx, (20, LATENT), jnp.float32)
    out2 = jax.block_until_ready(decoder_forward(latent2, params))
    ref2 = decoder_reference(latent2, params)
    assert out2.shape == (20, INPUT)
    assert jnp.max(jnp.abs(out2 - ref2)) < 2e-2, "mismatch vs f32 reference (B=20)"

    print("KERNEL_OK")
</pallas_src>

<mosaic_0001>
module attributes {stable_mosaic.version = 11 : i64} {
  func.func @_decoder_kernel(%arg0: i32, %arg1: memref<16x32xbf16, #tpu.memory_space<vmem>>, %arg2: memref<32x128xbf16, #tpu.memory_space<vmem>>, %arg3: memref<1x128xf32, #tpu.memory_space<vmem>>, %arg4: memref<128x128xbf16, #tpu.memory_space<vmem>>, %arg5: memref<1x128xf32, #tpu.memory_space<vmem>>, %arg6: memref<128x128xbf16, #tpu.memory_space<vmem>>, %arg7: memref<1x128xf32, #tpu.memory_space<vmem>>, %arg8: memref<128x128xbf16, #tpu.memory_space<vmem>>, %arg9: memref<1x128xf32, #tpu.memory_space<vmem>>, %arg10: memref<16x128xf32, #tpu.memory_space<vmem>>) attributes {dimension_semantics = [#tpu.dimension_semantics<parallel>], iteration_bounds = array<i64: 1>, scalar_prefetch = 0 : i64, scratch_operands = 0 : i64, tpu.core_type = #tpu.core_type<tc>, window_params = [{transform_indices = @transform_0, window_bounds = array<i64: 16, 32>}, {pipeline_mode = #tpu.pipeline_mode<synchronous>, transform_indices = @transform_1, window_bounds = array<i64: 32, 128>}, {pipeline_mode = #tpu.pipeline_mode<synchronous>, transform_indices = @transform_2, window_bounds = array<i64: 1, 128>}, {pipeline_mode = #tpu.pipeline_mode<synchronous>, transform_indices = @transform_3, window_bounds = array<i64: 128, 128>}, {pipeline_mode = #tpu.pipeline_mode<synchronous>, transform_indices = @transform_4, window_bounds = array<i64: 1, 128>}, {pipeline_mode = #tpu.pipeline_mode<synchronous>, transform_indices = @transform_5, window_bounds = array<i64: 128, 128>}, {pipeline_mode = #tpu.pipeline_mode<synchronous>, transform_indices = @transform_6, window_bounds = array<i64: 1, 128>}, {pipeline_mode = #tpu.pipeline_mode<synchronous>, transform_indices = @transform_7, window_bounds = array<i64: 128, 128>}, {pipeline_mode = #tpu.pipeline_mode<synchronous>, transform_indices = @transform_8, window_bounds = array<i64: 1, 128>}, {transform_indices = @transform_9, window_bounds = array<i64: 16, 128>}]} {
    %c0 = arith.constant 0 : index
    %c0_0 = arith.constant 0 : index
    %0 = vector.load %arg3[%c0, %c0_0] : memref<1x128xf32, #tpu.memory_space<vmem>>, vector<1x128xf32>
    %c0_1 = arith.constant 0 : index
    %c0_2 = arith.constant 0 : index
    %1 = vector.load %arg5[%c0_1, %c0_2] : memref<1x128xf32, #tpu.memory_space<vmem>>, vector<1x128xf32>
    %c0_3 = arith.constant 0 : index
    %c0_4 = arith.constant 0 : index
    %2 = vector.load %arg7[%c0_3, %c0_4] : memref<1x128xf32, #tpu.memory_space<vmem>>, vector<1x128xf32>
    %c0_5 = arith.constant 0 : index
    %c0_6 = arith.constant 0 : index
    %3 = vector.load %arg9[%c0_5, %c0_6] : memref<1x128xf32, #tpu.memory_space<vmem>>, vector<1x128xf32>
    %c0_7 = arith.constant 0 : index
    %c0_8 = arith.constant 0 : index
    %4 = vector.load %arg1[%c0_7, %c0_8] : memref<16x32xbf16, #tpu.memory_space<vmem>>, vector<16x32xbf16>
    %c0_9 = arith.constant 0 : index
    %c0_10 = arith.constant 0 : index
    %5 = vector.load %arg2[%c0_9, %c0_10] : memref<32x128xbf16, #tpu.memory_space<vmem>>, vector<32x128xbf16>
    %cst = arith.constant dense<0.000000e+00> : vector<16x128xf32>
    %6 = tpu.matmul %4, %5, %cst {dimension_numbers = #tpu.dot_dimension_numbers<[1], [0], [0], [1], [0, 0, 1, 1], [], []>} : vector<16x32xbf16>, vector<32x128xbf16>, vector<16x128xf32> -> vector<16x128xf32>
    %7 = vector.broadcast %0 : vector<1x128xf32> to vector<16x128xf32>
    %8 = arith.addf %6, %7 : vector<16x128xf32>
    %cst_11 = arith.constant 0.000000e+00 : f32
    %9 = vector.broadcast %cst_11 : f32 to vector<16x128xf32>
    %10 = arith.maximumf %8, %9 : vector<16x128xf32>
    %11 = arith.truncf %10 : vector<16x128xf32> to vector<16x128xbf16>
    %c0_12 = arith.constant 0 : index
    %c0_13 = arith.constant 0 : index
    %12 = vector.load %arg4[%c0_12, %c0_13] : memref<128x128xbf16, #tpu.memory_space<vmem>>, vector<128x128xbf16>
    %cst_14 = arith.constant dense<0.000000e+00> : vector<16x128xf32>
    %13 = tpu.matmul %11, %12, %cst_14 {dimension_numbers = #tpu.dot_dimension_numbers<[1], [0], [0], [1], [0, 0, 1, 1], [], []>} : vector<16x128xbf16>, vector<128x128xbf16>, vector<16x128xf32> -> vector<16x128xf32>
    %14 = vector.broadcast %1 : vector<1x128xf32> to vector<16x128xf32>
    %15 = arith.addf %13, %14 : vector<16x128xf32>
    %cst_15 = arith.constant 0.000000e+00 : f32
    %16 = vector.broadcast %cst_15 : f32 to vector<16x128xf32>
    %17 = arith.maximumf %15, %16 : vector<16x128xf32>
    %18 = arith.truncf %17 : vector<16x128xf32> to vector<16x128xbf16>
    %c0_16 = arith.constant 0 : index
    %c0_17 = arith.constant 0 : index
    %19 = vector.load %arg6[%c0_16, %c0_17] : memref<128x128xbf16, #tpu.memory_space<vmem>>, vector<128x128xbf16>
    %cst_18 = arith.constant dense<0.000000e+00> : vector<16x128xf32>
    %20 = tpu.matmul %18, %19, %cst_18 {dimension_numbers = #tpu.dot_dimension_numbers<[1], [0], [0], [1], [0, 0, 1, 1], [], []>} : vector<16x128xbf16>, vector<128x128xbf16>, vector<16x128xf32> -> vector<16x128xf32>
    %21 = vector.broadcast %2 : vector<1x128xf32> to vector<16x128xf32>
    %22 = arith.addf %20, %21 : vector<16x128xf32>
    %cst_19 = arith.constant 0.000000e+00 : f32
    %23 = vector.broadcast %cst_19 : f32 to vector<16x128xf32>
    %24 = arith.maximumf %22, %23 : vector<16x128xf32>
    %25 = arith.truncf %24 : vector<16x128xf32> to vector<16x128xbf16>
    %c0_20 = arith.constant 0 : index
    %c0_21 = arith.constant 0 : index
    %26 = vector.load %arg8[%c0_20, %c0_21] : memref<128x128xbf16, #tpu.memory_space<vmem>>, vector<128x128xbf16>
    %cst_22 = arith.constant dense<0.000000e+00> : vector<16x128xf32>
    %27 = tpu.matmul %25, %26, %cst_22 {dimension_numbers = #tpu.dot_dimension_numbers<[1], [0], [0], [1], [0, 0, 1, 1], [], []>} : vector<16x128xbf16>, vector<128x128xbf16>, vector<16x128xf32> -> vector<16x128xf32>
    %28 = vector.broadcast %3 : vector<1x128xf32> to vector<16x128xf32>
    %29 = arith.addf %27, %28 : vector<16x128xf32>
    %cst_23 = arith.constant 0.000000e+00 : f32
    %30 = vector.broadcast %cst_23 : f32 to vector<16x128xf32>
    %31 = arith.subf %30, %29 : vector<16x128xf32>
    %32 = math.exp %31 : vector<16x128xf32>
    %cst_24 = arith.constant 1.000000e+00 : f32
    %33 = vector.broadcast %cst_24 : f32 to vector<16x128xf32>
    %34 = arith.addf %33, %32 : vector<16x128xf32>
    %35 = tpu.reciprocal %34 {approx = true} : vector<16x128xf32> -> vector<16x128xf32>
    %c0_25 = arith.constant 0 : index
    %c0_26 = arith.constant 0 : index
    %36 = vector.load %arg10[%c0_25, %c0_26] : memref<16x128xf32, #tpu.memory_space<vmem>>, vector<16x128xf32>
    tpu.vector_store %arg10[%c0_25, %c0_26], %35 {strides = array<i32>} : memref<16x128xf32, #tpu.memory_space<vmem>>, vector<16x128xf32>,
    return
  }
  func.func @transform_0(%arg0: i32) -> (i32, i32) {
    %c0_i32 = arith.constant 0 : i32
    %c0_i32_0 = arith.constant 0 : i32
    return %arg0, %c0_i32 : i32, i32
  }
  func.func @transform_1(%arg0: i32) -> (i32, i32) {
    %c0_i32 = arith.constant 0 : i32
    %c0_i32_0 = arith.constant 0 : i32
    %c0_i32_1 = arith.constant 0 : i32
    return %c0_i32, %c0_i32_0 : i32, i32
  }
  func.func @transform_2(%arg0: i32) -> (i32, i32) {
    %c0_i32 = arith.constant 0 : i32
    %c0_i32_0 = arith.constant 0 : i32
    %c0_i32_1 = arith.constant 0 : i32
    return %c0_i32, %c0_i32_0 : i32, i32
  }
  func.func @transform_3(%arg0: i32) -> (i32, i32) {
    %c0_i32 = arith.constant 0 : i32
    %c0_i32_0 = arith.constant 0 : i32
    %c0_i32_1 = arith.constant 0 : i32
    return %c0_i32, %c0_i32_0 : i32, i32
  }
  func.func @transform_4(%arg0: i32) -> (i32, i32) {
    %c0_i32 = arith.constant 0 : i32
    %c0_i32_0 = arith.constant 0 : i32
    %c0_i32_1 = arith.constant 0 : i32
    return %c0_i32, %c0_i32_0 : i32, i32
  }
  func.func @transform_5(%arg0: i32) -> (i32, i32) {
    %c0_i32 = arith.constant 0 : i32
    %c0_i32_0 = arith.constant 0 : i32
    %c0_i32_1 = arith.constant 0 : i32
    return %c0_i32, %c0_i32_0 : i32, i32
  }
  func.func @transform_6(%arg0: i32) -> (i32, i32) {
    %c0_i32 = arith.constant 0 : i32
    %c0_i32_0 = arith.constant 0 : i32
    %c0_i32_1 = arith.constant 0 : i32
    return %c0_i32, %c0_i32_0 : i32, i32
  }
  func.func @transform_7(%arg0: i32) -> (i32, i32) {
    %c0_i32 = arith.constant 0 : i32
    %c0_i32_0 = arith.constant 0 : i32
    %c0_i32_1 = arith.constant 0 : i32
    return %c0_i32, %c0_i32_0 : i32, i32
  }
  func.func @transform_8(%arg0: i32) -> (i32, i32) {
    %c0_i32 = arith.constant 0 : i32
    %c0_i32_0 = arith.constant 0 : i32
    %c0_i32_1 = arith.constant 0 : i32
    return %c0_i32, %c0_i32_0 : i32, i32
  }
  func.func @transform_9(%arg0: i32) -> (i32, i32) {
    %c0_i32 = arith.constant 0 : i32
    %c0_i32_0 = arith.constant 0 : i32
    return %arg0, %c0_i32 : i32, i32
  }
}

</mosaic_0001>

<bundles_post_ra>
// kernel: decoder_forward.1
= control target key start
LH: loop header
LB: loop body
LE: loop exit
PB: predicated region body
PF: predicated region fallthrough
CT: control target
= control target key end

     0   :  { %s690_s0 = inlined_call_operand.vmem [shape: bf16[16,32], index: 0, kind: input, shape index: {}]   ;;  %s691_s1 = inlined_call_operand.vmem [shape: bf16[32,128], index: 1, kind: input, shape index: {}]   ;;  %s692_s2 = inlined_call_operand.vmem [shape: f32[1,128], index: 2, kind: input, shape index: {}]   ;;  %s693_s3 = inlined_call_operand.vmem [shape: bf16[128,128], index: 3, kind: input, shape index: {}]   ;;  %s694_s4 = inlined_call_operand.vmem [shape: f32[1,128], index: 4, kind: input, shape index: {}]   ;;  %s695_s5 = inlined_call_operand.vmem [shape: bf16[128,128], index: 5, kind: input, shape index: {}]   ;;  %s696_s6 = inlined_call_operand.vmem [shape: f32[1,128], index: 6, kind: input, shape index: {}]   ;;  %s697_s7 = inlined_call_operand.vmem [shape: bf16[128,128], index: 7, kind: input, shape index: {}]   ;;  %s698_s8 = inlined_call_operand.vmem [shape: f32[1,128], index: 8, kind: input, shape index: {}]   ;;  %s699_s9 = inlined_call_operand.hbm [shape: f32[16,128], index: 9, kind: output, shape index: {}]  }
   0x1   :  { %v475_v0 = vld [vmem:[%s691_s1 + $0x8] sm:$0xff]  ;;  %v483_v1 = vld [vmem:[%s693_s3 + $0x38] sm:$0xff]  ;;  %v474_v2 = vld [vmem:[%s691_s1] sm:$0xff] }
   0x2   :  { %74 = vmatpush.bf16.msra.mxu0 %v475_v0  ;;  %v482_v3 = vld [vmem:[%s693_s3 + $0x30] sm:$0xff]  ;;  %152 = vmatpush.bf16.msra.mxu1 %v483_v1 }
   0x3   :  { %14 = vsyncpa [#allocation3], 0  ;;  %v473_v4 = vld [vmem:[%s690_s0] sm:$0xff]  ;;  %vm64_vm0 = vcmask 261120   ;;  %v481_v5 = vld [vmem:[%s693_s3 + $0x28] sm:$0xff]  ;;  %s352_s1 = sshll.u32 %s699_s9, 4  ;;  %s353_s1 = int_to_ptr.hbm [resolvable:$true] %s352_s1 }
   0x4   :  { %v480_v6 = vld [vmem:[%s693_s3 + $0x20] sm:$0xff]  ;;  %v479_v7 = vld [vmem:[%s693_s3 + $0x18] sm:$0xff]  ;;  %v478_v8 = vld [vmem:[%s693_s3 + $0x10] sm:$0xff]  ;;  %s542_s21 = smov 128  }
   0x5   :  { %v477_v9 = vld [vmem:[%s693_s3 + $0x8] sm:$0xff]  ;;  %v476_v10 = vld [vmem:[%s693_s3] sm:$0xff]  ;;  %v491_v11 = vld [vmem:[%s695_s5 + $0x38] sm:$0xff] }
   0x6   :  { %75 = vmatpush.bf16.msra.mxu0 %v474_v2  ;;  %153 = vmatpush.bf16.msra.mxu1 %v482_v3  ;;  %v490_v12 = vld [vmem:[%s695_s5 + $0x30] sm:$0xff]  ;;  %v489_v13 = vld [vmem:[%s695_s5 + $0x28] sm:$0xff]  ;;  %v488_v14 = vld [vmem:[%s695_s5 + $0x20] sm:$0xff] }
   0x7   :  { %236 = vmatpush.bf16.msra.mxu2 %v491_v11  ;;  %v503_v16 = vld [vmem:[%s692_s2] ss:$0 sm:$0xff]  ;;  %v487_v23 = vld [vmem:[%s695_s5 + $0x18] sm:$0xff]  ;;  %v486_v24 = vld [vmem:[%s695_s5 + $0x10] sm:$0xff]  ;;  %s543_s2 = smov 8  }
   0x8   :  { %v485_v25 = vld [vmem:[%s695_s5 + $0x8] sm:$0xff]  ;;  %v484_v26 = vld [vmem:[%s695_s5] sm:$0xff]  ;;  %v499_v27 = vld [vmem:[%s697_s7 + $0x38] sm:$0xff] }
   0x9   :  { %376 = vmatmul.msk.bf16.vlgmr.msra.gmra.mxu0 %vm64_vm0, %v473_v4  ;;  %320 = vmatpush.bf16.msra.mxu3 %v499_v27  ;;  %v498_v28 = vld [vmem:[%s697_s7 + $0x30] sm:$0xff]  ;;  %v497_v29 = vld [vmem:[%s697_s7 + $0x28] sm:$0xff]  ;;  %v496_v30 = vld [vmem:[%s697_s7 + $0x20] sm:$0xff] }
   0xa   :  { %154 = vmatpush.bf16.msra.mxu1 %v481_v5  ;;  %v504_v32 = vld [vmem:[%s694_s4] ss:$0 sm:$0xff]  ;;  %v495_v39 = vld [vmem:[%s697_s7 + $0x18] sm:$0xff]  ;;  %v494_v40 = vld [vmem:[%s697_s7 + $0x10] sm:$0xff] }
   0xb   :  { %237 = vmatpush.bf16.msra.mxu2 %v490_v12  ;;  %v493_v41 = vld [vmem:[%s697_s7 + $0x8] sm:$0xff]  ;;  %v492_v42 = vld [vmem:[%s697_s7] sm:$0xff] }
   0xc   :  { %v505_v44 = vld [vmem:[%s696_s6] ss:$0 sm:$0xff]  ;;  %s541_s6 = smov [#allocation2]  }
   0xd   :  { %321 = vmatpush.bf16.msra.mxu3 %v498_v28  ;;  %v506_v51 = vld [vmem:[%s698_s8] ss:$0 sm:$0xff]  ;;  %s350_s7 = sshll.u32 %s541_s6, 4  ;;  %s351_s7 = int_to_ptr.vmem [resolvable:$true] %s350_s7 }
   0xe   :  { %155 = vmatpush.bf16.msra.mxu1 %v480_v6 }
   0xf   :  { %238 = vmatpush.bf16.msra.mxu2 %v489_v13 }
  0x11   :  { %322 = vmatpush.bf16.msra.mxu3 %v497_v29 }
  0x12   :  { %156 = vmatpush.bf16.msra.mxu1 %v479_v7 }
  0x13   :  { %239 = vmatpush.bf16.msra.mxu2 %v488_v14 }
  0x15   :  { %323 = vmatpush.bf16.msra.mxu3 %v496_v30 }
  0x16   :  { %157 = vmatpush.bf16.msra.mxu1 %v478_v8 }
  0x17   :  { %240 = vmatpush.bf16.msra.mxu2 %v487_v23 }
  0x19   :  { %324 = vmatpush.bf16.msra.mxu3 %v495_v39 }
  0x1a   :  { %158 = vmatpush.bf16.msra.mxu1 %v477_v9 }
  0x1b   :  { %241 = vmatpush.bf16.msra.mxu2 %v486_v24 }
  0x1d   :  { %325 = vmatpush.bf16.msra.mxu3 %v494_v40 }
  0x1e   :  { %159 = vmatpush.bf16.msra.mxu1 %v476_v10 }
  0x1f   :  { %242 = vmatpush.bf16.msra.mxu2 %v485_v25 }
  0x21   :  { %326 = vmatpush.bf16.msra.mxu3 %v493_v41 }
  0x23   :  { %243 = vmatpush.bf16.msra.mxu2 %v484_v26 }
  0x25   :  { %327 = vmatpush.bf16.msra.mxu3 %v492_v42 }
  0x86   :  { %v77_v15 = vpop.f32.mrf.mxu0 }
  0x87   :  { %v78_v17 = vadd.f32 %v503_v16, %v77_v15 }
  0x89   :  { %v82_v20 = vmax.f32 %v78_v17, 0.0 }
  0x8e   :  { %v79_v18 = vpop.f32.mrf.mxu0 }
  0x8f   :  { %v80_v19 = vadd.f32 %v503_v16, %v79_v18 }
  0x91   :  { %v83_v21 = vmax.f32 %v80_v19, 0.0 }
  0x93   :  { %v84_v22 = vpack.c.bf16 %v83_v21, %v82_v20 }
  0x95   :  { %160 = vmatmul.bf16.vlgmr.msra.gmra.mxu1 %v84_v22 }
 0x112   :  { %v161_v31 = vpop.f32.mrf.mxu1 }
 0x113   :  { %v162_v33 = vadd.f32 %v504_v32, %v161_v31 }
 0x115   :  { %v166_v36 = vmax.f32 %v162_v33, 0.0 }
 0x11a   :  { %v163_v34 = vpop.f32.mrf.mxu1 }
 0x11b   :  { %v164_v35 = vadd.f32 %v504_v32, %v163_v34 }
 0x11d   :  { %v167_v37 = vmax.f32 %v164_v35, 0.0 }
 0x11f   :  { %v168_v38 = vpack.c.bf16 %v167_v37, %v166_v36 }
 0x121   :  { %244 = vmatmul.bf16.vlgmr.msra.gmra.mxu2 %v168_v38 }
 0x1a4   :  { %v245_v43 = vpop.f32.mrf.mxu2 }
 0x1a5   :  { %v246_v45 = vadd.f32 %v505_v44, %v245_v43 }
 0x1a7   :  { %v250_v48 = vmax.f32 %v246_v45, 0.0 }
 0x1ac   :  { %v247_v46 = vpop.f32.mrf.mxu2 }
 0x1ad   :  { %v248_v47 = vadd.f32 %v505_v44, %v247_v46 }
 0x1af   :  { %v251_v49 = vmax.f32 %v248_v47, 0.0 }
 0x1b1   :  { %v252_v50 = vpack.c.bf16 %v251_v49, %v250_v48 }
 0x1b3   :  { %328 = vmatmul.bf16.vlgmr.msra.gmra.mxu3 %v252_v50 }
 0x236   :  { %v329_v52 = vpop.f32.mrf.mxu3 }
 0x237   :  { %v330_v53 = vadd.f32 %v506_v51, %v329_v52 }
 0x239   :  { %v334_v54 = vsub.f32 0.0, %v330_v53 }
 0x23b   :  { %v336_v55 = vmul.f32 1.442695, %v334_v54 }
 0x23d   :  { %507 = vpow2.f32 %v336_v55 }
 0x23e   :  { %v331_v56 = vpop.f32.mrf.mxu3 }
 0x23f   :  { %v332_v57 = vadd.f32 %v506_v51, %v331_v56 }
 0x241   :  { %v335_v58 = vsub.f32 0.0, %v332_v57 }
 0x243   :  { %v508_v59 = vpop.eup %507  ;;  %v338_v60 = vmul.f32 1.442695, %v335_v58 }
 0x244   :  { %v340_v61 = vadd.f32 1.0, %v508_v59 }
 0x245   :  { %509 = vpow2.f32 %v338_v60 }
 0x246   :  { %511 = vrcp.f32 %v340_v61 }
 0x24b   :  { %v510_v62 = vpop.eup %509 }
 0x24c   :  { %v512_v63 = vpop.eup %511  ;;  %v341_v0 = vadd.f32 1.0, %v510_v62 }
 0x24d   :  { %344 = vst [vmem:[#allocation2] sm:$0xff] %v512_v63 }
 0x24e   :  { %513 = vrcp.f32 %v341_v0 }
 0x254   :  { %v514_v1 = vpop.eup %513 }
 0x255   :  { %345 = vst [vmem:[#allocation2 + $0x8] sm:$0xff] %v514_v1 }
 0x256   :  { %358 = dma.vmem_to_hbm [thread:$0]  %s351_s7, 256, %s353_s1, [#allocation3], %s542_s21, %s542_s21, %s543_s2  }
 0x257   :  { %539 = dma.done.wait [#allocation3], 256  }
 0x258   :  { %540 = vsyncadd [#allocation3], 4294967040 }
 0x259   :  { %363 = vsyncpa [#allocation3], 1 }

</bundles_post_ra>
